<compile_context>
chip_gen: v5e
topology: v5e:2x2
jax: 0.10.0
libtpu: 0.0.40
codegen_flags: <defaults>
</compile_context>

<pallas_src>
import jax
import jax.numpy as jnp
from jax.experimental import pallas as pl
from jax.experimental.pallas import tpu as pltpu


def _conv1x1_bn_silu_kernel(x_ref, w_ref, scale_ref, shift_ref, o_ref):
    # x_ref:       (c1,    tpx)  channels-as-sublanes, pixels lane-dense
    # w_ref:       (c_out, c1)   weight-stationary LHS
    # scale/shift: (c_out, 1)    folded BatchNorm (per output channel)
    # o_ref:       (c_out, tpx)
    acc = jnp.dot(w_ref[...], x_ref[...], preferred_element_type=jnp.float32)
    y = acc * scale_ref[...] + shift_ref[...]                    # BN (inference)
    o_ref[...] = (y * jax.nn.sigmoid(y)).astype(o_ref.dtype)     # SiLU


def _pick_pixel_tile(HW, c1, c_out, itemsize, vmem_budget_bytes=24 << 20):
    """Largest lane-dense (multiple-of-128) pixel tile that fits the VMEM budget.

    Accounts for double-buffered input (c1 rows), double-buffered output
    (c_out rows, f32 epilogue temporaries ~ same order), clamped to [128, 2048]
    and to the (padded) image size.
    """
    bytes_per_px_col = 2 * (c1 * itemsize) + 2 * (c_out * 4)   # in (x2) + out (x2, f32)
    tpx = (vmem_budget_bytes // max(bytes_per_px_col, 1)) // 128 * 128
    tpx = max(128, min(int(tpx), 2048))
    tpx = min(tpx, pl.cdiv(HW, 128) * 128)
    return tpx


def conv_bn_silu(x_nchw, w, bn_gamma, bn_beta, bn_mean, bn_var, eps=1e-5, tpx=None):
    """Fused Conv2d(k=1, s=1, g=1, bias=False) + BatchNorm2d (running stats) + SiLU.

    x_nchw: (N, c1, H, W);  w: (c_out, c1) 1x1 conv weight.
    Output: (N, c_out, H, W) in the input dtype (f32 accumulation inside).
    """
    # TODO(synk): only the module defaults k=1, s=1, groups=1 are implemented;
    # a general k>1 spatial conv / grouped conv has no kernel here.
    N, c1, H, W = x_nchw.shape
    c_out = w.shape[0]
    HW = H * W

    if tpx is None:
        tpx = _pick_pixel_tile(HW, c1, c_out, jnp.dtype(x_nchw.dtype).itemsize)
    else:
        tpx = max(128, min(int(tpx), pl.cdiv(HW, 128) * 128))
    HWp = pl.cdiv(HW, tpx) * tpx

    # NCHW kept as-is: (N, c1, H*W).  Pad pixels so the grid divides evenly; the
    # padding is sliced off afterwards (stores stay unmasked / lane-dense).
    x = x_nchw.reshape(N, c1, HW)
    if HWp != HW:
        x = jnp.pad(x, ((0, 0), (0, 0), (0, HWp - HW)))

    # Fold BatchNorm (inference statistics) into per-channel scale/shift:
    # y = conv * gamma/sqrt(var+eps) + (beta - mean*gamma/sqrt(var+eps))
    # TODO(synk): PyTorch BatchNorm in train mode uses batch statistics; this is
    # the standard fused-inference running-stat form.
    inv_std = 1.0 / jnp.sqrt(bn_var.astype(jnp.float32) + eps)
    scale = (bn_gamma.astype(jnp.float32) * inv_std).reshape(c_out, 1)
    shift = (bn_beta.astype(jnp.float32)
             - bn_mean.astype(jnp.float32) * bn_gamma.astype(jnp.float32) * inv_std
             ).reshape(c_out, 1)

    w_k = w.reshape(c_out, c1).astype(x.dtype)

    grid = (N, HWp // tpx)
    out = pl.pallas_call(
        _conv1x1_bn_silu_kernel,
        out_shape=jax.ShapeDtypeStruct((N, c_out, HWp), x_nchw.dtype),
        grid_spec=pltpu.PrefetchScalarGridSpec(
            num_scalar_prefetch=0,
            grid=grid,
            in_specs=[
                # (1, c1, tpx) block with batch dim squeezed -> kernel sees (c1, tpx)
                pl.BlockSpec((None, c1, tpx), lambda n, p: (n, 0, p)),
                # Weight / BN params: same block every step -> stay resident in VMEM.
                pl.BlockSpec((c_out, c1), lambda n, p: (0, 0)),
                pl.BlockSpec((c_out, 1), lambda n, p: (0, 0)),
                pl.BlockSpec((c_out, 1), lambda n, p: (0, 0)),
            ],
            out_specs=pl.BlockSpec((None, c_out, tpx), lambda n, p: (n, 0, p)),
        ),
        compiler_params=pltpu.CompilerParams(
            dimension_semantics=("parallel", "parallel"),
            vmem_limit_bytes=64 << 20,
        ),
    )(x, w_k, scale, shift)

    # Drop pixel padding and restore spatial dims (already NCHW channel order).
    return out[:, :, :HW].reshape(N, c_out, H, W)


if __name__ == "__main__":
    key = jax.random.PRNGKey(0)
    N, c1, c_out, H, W = 2, 4, 16, 16, 16

    k_x, k_w = jax.random.split(key, 2)
    x = jax.random.normal(k_x, (N, c1, H, W), dtype=jnp.float32)

    # Deterministic parameters: 1x1 conv (bias=False) + non-trivial BN stats.
    w = jax.random.normal(k_w, (c_out, c1), dtype=jnp.float32) * 0.1
    bn_gamma = 1.0 + 0.05 * jnp.arange(c_out, dtype=jnp.float32)
    bn_beta = 0.01 * jnp.arange(c_out, dtype=jnp.float32)
    bn_mean = 0.02 * jnp.arange(c_out, dtype=jnp.float32)
    bn_var = 1.0 + 0.03 * jnp.arange(c_out, dtype=jnp.float32)

    out = conv_bn_silu(x, w, bn_gamma, bn_beta, bn_mean, bn_var)
    jax.block_until_ready(out)

    # Pure-JAX reference.
    conv = jnp.einsum('nchw,oc->nohw', x, w)
    inv_std = 1.0 / jnp.sqrt(bn_var + 1e-5)
    bn = (conv - bn_mean[None, :, None, None]) \
        * (bn_gamma * inv_std)[None, :, None, None] \
        + bn_beta[None, :, None, None]
    ref = bn * jax.nn.sigmoid(bn)
    assert out.shape == ref.shape
    assert jnp.allclose(out, ref, atol=1e-4, rtol=1e-4)

    print("KERNEL_OK")
</pallas_src>

<mosaic_0001>
module attributes {stable_mosaic.version = 11 : i64} {
  func.func @_conv1x1_bn_silu_kernel(%arg0: i32, %arg1: i32, %arg2: memref<1x4x256xf32, #tpu.memory_space<vmem>>, %arg3: memref<16x4xf32, #tpu.memory_space<vmem>>, %arg4: memref<16x1xf32, #tpu.memory_space<vmem>>, %arg5: memref<16x1xf32, #tpu.memory_space<vmem>>, %arg6: memref<1x16x256xf32, #tpu.memory_space<vmem>>) attributes {dimension_semantics = [#tpu.dimension_semantics<parallel>, #tpu.dimension_semantics<parallel>], iteration_bounds = array<i64: 2, 1>, scalar_prefetch = 0 : i64, scratch_operands = 0 : i64, tpu.core_type = #tpu.core_type<tc>, window_params = [{transform_indices = @transform_0, window_bounds = array<i64: 1, 4, 256>}, {pipeline_mode = #tpu.pipeline_mode<synchronous>, transform_indices = @transform_1, window_bounds = array<i64: 16, 4>}, {pipeline_mode = #tpu.pipeline_mode<synchronous>, transform_indices = @transform_2, window_bounds = array<i64: 16, 1>}, {pipeline_mode = #tpu.pipeline_mode<synchronous>, transform_indices = @transform_3, window_bounds = array<i64: 16, 1>}, {transform_indices = @transform_4, window_bounds = array<i64: 1, 16, 256>}]} {
    %c0 = arith.constant 0 : index
    %c0_0 = arith.constant 0 : index
    %0 = vector.load %arg3[%c0, %c0_0] : memref<16x4xf32, #tpu.memory_space<vmem>>, vector<16x4xf32>
    %c0_1 = arith.constant 0 : index
    %c0_2 = arith.constant 0 : index
    %c0_3 = arith.constant 0 : index
    %1 = vector.load %arg2[%c0_1, %c0_2, %c0_3] : memref<1x4x256xf32, #tpu.memory_space<vmem>>, vector<1x4x256xf32>
    %2 = vector.shape_cast %1 : vector<1x4x256xf32> to vector<4x256xf32>
    %cst = arith.constant dense<0.000000e+00> : vector<16x256xf32>
    %3 = tpu.matmul %0, %2, %cst {dimension_numbers = #tpu.dot_dimension_numbers<[1], [0], [0], [1], [0, 0, 1, 1], [], []>} : vector<16x4xf32>, vector<4x256xf32>, vector<16x256xf32> -> vector<16x256xf32>
    %c0_4 = arith.constant 0 : index
    %c0_5 = arith.constant 0 : index
    %4 = vector.load %arg4[%c0_4, %c0_5] : memref<16x1xf32, #tpu.memory_space<vmem>>, vector<16x1xf32>
    %5 = vector.broadcast %4 : vector<16x1xf32> to vector<16x256xf32>
    %6 = arith.mulf %3, %5 : vector<16x256xf32>
    %c0_6 = arith.constant 0 : index
    %c0_7 = arith.constant 0 : index
    %7 = vector.load %arg5[%c0_6, %c0_7] : memref<16x1xf32, #tpu.memory_space<vmem>>, vector<16x1xf32>
    %8 = vector.broadcast %7 : vector<16x1xf32> to vector<16x256xf32>
    %9 = arith.addf %6, %8 : vector<16x256xf32>
    %10 = arith.negf %9 : vector<16x256xf32>
    %11 = math.exp %10 : vector<16x256xf32>
    %cst_8 = arith.constant 1.000000e+00 : f32
    %12 = vector.broadcast %cst_8 : f32 to vector<16x256xf32>
    %13 = arith.addf %12, %11 : vector<16x256xf32>
    %14 = arith.divf %12, %13 : vector<16x256xf32>
    %15 = arith.mulf %9, %14 : vector<16x256xf32>
    %c0_9 = arith.constant 0 : index
    %c0_10 = arith.constant 0 : index
    %c0_11 = arith.constant 0 : index
    %16 = vector.load %arg6[%c0_9, %c0_10, %c0_11] : memref<1x16x256xf32, #tpu.memory_space<vmem>>, vector<1x16x256xf32>
    %17 = vector.shape_cast %16 : vector<1x16x256xf32> to vector<16x256xf32>
    %18 = vector.shape_cast %15 : vector<16x256xf32> to vector<1x16x256xf32>
    tpu.vector_store %arg6[%c0_9, %c0_10, %c0_11], %18 {strides = array<i32>} : memref<1x16x256xf32, #tpu.memory_space<vmem>>, vector<1x16x256xf32>,
    return
  }
  func.func @transform_0(%arg0: i32, %arg1: i32) -> (i32, i32, i32) {
    %c0_i32 = arith.constant 0 : i32
    %c0_i32_0 = arith.constant 0 : i32
    return %arg0, %c0_i32, %arg1 : i32, i32, i32
  }
  func.func @transform_1(%arg0: i32, %arg1: i32) -> (i32, i32) {
    %c0_i32 = arith.constant 0 : i32
    %c0_i32_0 = arith.constant 0 : i32
    %c0_i32_1 = arith.constant 0 : i32
    return %c0_i32, %c0_i32_0 : i32, i32
  }
  func.func @transform_2(%arg0: i32, %arg1: i32) -> (i32, i32) {
    %c0_i32 = arith.constant 0 : i32
    %c0_i32_0 = arith.constant 0 : i32
    %c0_i32_1 = arith.constant 0 : i32
    return %c0_i32, %c0_i32_0 : i32, i32
  }
  func.func @transform_3(%arg0: i32, %arg1: i32) -> (i32, i32) {
    %c0_i32 = arith.constant 0 : i32
    %c0_i32_0 = arith.constant 0 : i32
    %c0_i32_1 = arith.constant 0 : i32
    return %c0_i32, %c0_i32_0 : i32, i32
  }
  func.func @transform_4(%arg0: i32, %arg1: i32) -> (i32, i32, i32) {
    %c0_i32 = arith.constant 0 : i32
    %c0_i32_0 = arith.constant 0 : i32
    return %arg0, %c0_i32, %arg1 : i32, i32, i32
  }
}

</mosaic_0001>

<bundles_post_ra>
// kernel: tpu_custom_call.1
= control target key start
LH: loop header
LB: loop body
LE: loop exit
PB: predicated region body
PF: predicated region fallthrough
CT: control target
= control target key end

     0   :  { %9 = vsyncpa [#allocation3], 0  ;;  %s869_s0 = inlined_call_operand.vmem [shape: f32[2,4,256], index: 0, kind: input, shape index: {}]   ;;  %s870_s1 = inlined_call_operand.vmem [shape: f32[16,4], index: 1, kind: input, shape index: {}]   ;;  %s871_s2 = inlined_call_operand.vmem [shape: f32[16,1], index: 2, kind: input, shape index: {}]   ;;  %s872_s3 = inlined_call_operand.vmem [shape: f32[16,1], index: 3, kind: input, shape index: {}]   ;;  %s873_s4 = inlined_call_operand.hbm [shape: f32[2,16,256], index: 4, kind: output, shape index: {}]  }
   0x1   :  { %11 = vsyncpa [#allocation3 + $0x1], 0  ;;  %s716_s15 = smov 0   ;;  %s718_s16 = smov 0  }
   0x2   :  { %s720_s17 = smov 0   ;;  %s722_s18 = smov 0  }
   0x3   :  { %s724_s19 = smov 0   ;;  %s726_s20 = smov 0  }
   0x4 LB: > { %s505_s21 = sadd.s32 4294967295, %s686_s20   ;;  %s506_s22 = sadd.s32 4294967294, %s686_s20   ;;  %s686_s20 = sphi %s726_s20, %s17_s20   ;;  %s682_s19 = sphi %s724_s19, %s880_s19   ;;  %s678_s18 = sphi %s722_s18, %s879_s18   ;;  %s674_s17 = sphi %s720_s17, %s878_s17   ;;  %s670_s16 = sphi %s718_s16, %s877_s16   ;;  %s666_s15 = sphi %s716_s15, %s876_s15  }
   0x5   : > { %s29_s23 = sadd.s32 1, %s682_s19  ;;  %s129_s24 = sadd.s32 1, %s674_s17 }
   0x6   : > { %p31_p0 = scmp.ge.s32.totalorder %s29_s23, 2  ;;  %p139_p1 = scmp.ne.s32.totalorder %s674_s17, %s670_s16 }
   0x7   : > { %p140_p2 = scmp.eq.s32.totalorder %s505_s21, 1  ;;  %p145_p3 = scmp.ne.s32.totalorder %s670_s16, %s666_s15 }
   0x8   : > { %s882_s23 = smov (%p31_p0, %s29_s23), 0  ;;  %p146_p5 = scmp.eq.s32.totalorder %s506_s22, 1 }
   0x9   : > { %p756_p4 = por %p140_p2, %p139_p1  ;;  %s124_s26 = ssub.s32 %s682_s19, %s882_s23 }
   0xa   : > { %p509_p6 = scmp.ge.s32.totalorder %s686_s20, 1  ;;  %p127_p7 = scmp.eq.s32.totalorder %s124_s26, 0 }
   0xb   : > { %p763_p8 = por %p146_p5, %p145_p3  ;;  %p186_p9 = scmp.lt.s32.totalorder %s686_s20, 3 }
   0xc   : > { %s769_s28 = scalar_select %p127_p7, %s674_s17, %s129_s24  }
   0xd   : > { %p187_p10 = pnand %p509_p6, %p186_p9 }
   0xe   : > { %p217_p11 = scmp.lt.s32.totalorder (!%p187_p10), %s678_s18, 1  ;;  %s213_s30 = sand.u32 (!%p187_p10), 1, %s670_s16  }
   0xf   : > { %190 = sbr.rel (%p187_p10) target bundleno = 206 (0xce), region = 36  ;;  %s815_s5 = sshll.u32 (!%p187_p10), %s213_s30, 5 }
  0x10   : > { %s529_s6 = sshll.u32 (!%p187_p10), %s678_s18, 5  ;;  %s215_s9 = scalar_lea.vmem (!%p187_p10), [#allocation2], %s815_s5 }
  0x11   : > { %s423_s10 = sshll.u32 (!%p187_p10), %s215_s9, 4  ;;  %s409_s12 = scalar_lea.sflag (!%p187_p10), [#allocation3], %s213_s30  ;;  %s424_s10 = int_to_ptr.vmem [resolvable:$true] %s423_s10 }
  0x12   : > { %s628_s24 = scalar_lea.hbm (!%p187_p10), %s873_s4, 64 }
  0x14   : > { %v688_v0 = vmov 0   ;;  %v292_v1 = vld [vmem:[%s871_s2] sm:$0xff]  ;;  %s218_s7 = scalar_select %p217_p11, %s678_s18, 1  ;;  %v293_v4 = vld [vmem:[%s871_s2 + $0x8] sm:$0xff]  ;;  %vm241_vm0 = vcmask 1043456   ;;  %vm234_vm1 = vcmask 31744  }
  0x15   : > { %590 = vset.pattern.permute.xlu0 %v688_v0  ;;  %591 = vset.pattern.permute.xlu1 %v688_v0  ;;  %v308_v2 = vld [vmem:[%s872_s3] sm:$0xff]  ;;  %v309_v5 = vld [vmem:[%s872_s3 + $0x8] sm:$0xff]  ;;  %s422_s18 = scalar_lea.hbm %s873_s4, %s529_s6 }
  0x16   : > { %296 = vperm.xlu0 %590, %v292_v1   ;;  %312 = vperm.xlu1 %591, %v308_v2   ;;  %s528_s8 = sshll.u32 %s218_s7, 3  ;;  %v227_v6 = vld [vmem:[%s870_s1] sm:$0xff]  ;;  %v228_v7 = vld [vmem:[%s870_s1 + $0x8] sm:$0xff] }
  0x17   : > { %s224_s11 = scalar_lea.vmem %s869_s0, %s528_s8 }
  0x18   : > { %v229_v3 = vld [vmem:[%s224_s11] sm:$0xff]  ;;  %s425_s11 = sshll.u32 %s422_s18, 4  ;;  %s426_s11 = int_to_ptr.hbm [resolvable:$true] %s425_s11 }
  0x19   : > { %231 = vst [vmem:[#allocation1] ss:$2 sm:$0xff] %v229_v3  ;;  %s622_s13 = sshra.s32 %s426_s11, 4  ;;  %s623_s13 = int_to_ptr.hbm [resolvable:$true] %s622_s13 }
  0x1a   : > { %s624_s14 = scalar_lea.hbm %s623_s13, 32  ;;  %p629_p1 = scmp.lt.s32.totalorder %s623_s13, %s873_s4 }
  0x1b   : > { %p625_p12 = scmp.ne.s32.totalorder %s623_s13, %s624_s14  ;;  %p630_p2 = scmp.lt.s32.totalorder %s628_s24, %s624_s14 }
  0x1d   : > { %p626_p13 = pnand %p625_p12, %p756_p4  ;;  %p631_p3 = por %p630_p2, %p629_p1 }
  0x1e   : > { %301 = vperm.xlu0 %590, %v293_v4   ;;  %317 = vperm.xlu1 %591, %v309_v5  }
  0x1f   : > { %p627_p0 = pneg %p626_p13 }
  0x20   : > { %v232_v8 = vld.sshfl [vmem:[#allocation1] sm:$0xff pattern:$0x75316420]  ;;  %v233_v9 = vld.sshfl [vmem:[#allocation1 + $0x8] sm:$0xff pattern:$0x75316420] }
  0x21   : > { %513 = vmatpush.msk.msra.mxu0 %vm241_vm0, %v232_v8  ;;  %530 = vmatpush.msk.msra.mxu2 %vm241_vm0, %v232_v8  ;;  %p632_p5 = pnand %p631_p3, %p627_p0 }
  0x22   : > { %516 = vmatpush.msk.msra.mxu1 %vm241_vm0, %v233_v9  ;;  %531 = vmatpush.msk.msra.mxu3 %vm241_vm0, %v233_v9 }
  0x23   : > { %514 = vmatmul.msk.f32.vlgmr.msra.gmra.mxu0 %vm234_vm1, %v227_v6  ;;  %515 = vmatmul.msk.f32.vlgmr.msra.gmra.mxu2 %vm234_vm1, %v228_v7 }
  0x24   : > { %517 = vmatmul.msk.f32.vlgmr.msra.gmra.mxu1 %vm234_vm1, %v227_v6  ;;  %518 = vmatmul.msk.f32.vlgmr.msra.gmra.mxu3 %vm234_vm1, %v228_v7 }
  0x88   : > { %v297_v10 = vpop.permute.xlu0 %296  ;;  %v313_v11 = vpop.permute.xlu1 %312 }
  0x90   : > { %v302_v19 = vpop.permute.xlu0 %301  ;;  %v318_v24 = vpop.permute.xlu1 %317 }
  0xa0   : > { %v263_v12 = vpop.f32.mrf.mxu0 }
  0xa1   : > { %v304_v13 = vmul.f32 %v297_v10, %v263_v12  ;;  %v286_v14 = vpop.f32.mrf.mxu1 }
  0xa2   : > { %v305_v15 = vmul.f32 %v297_v10, %v286_v14 }
  0xa3   : > { %v794_v16 = vadd.f32 %v313_v11, %v304_v13 }
  0xa4   : > { %v796_v17 = vadd.f32 %v313_v11, %v305_v15 }
  0xa5   : > { %v519_v18 = vmul.f32 -1.442695, %v794_v16 }
  0xa6   : > { %v520_v20 = vmul.f32 -1.442695, %v796_v17  ;;  %v266_v21 = vpop.f32.mrf.mxu2 }
  0xa7   : > { %592 = vpow2.f32 %v519_v18  ;;  %v306_v22 = vmul.f32 %v302_v19, %v266_v21  ;;  %v289_v23 = vpop.f32.mrf.mxu3 }
  0xa8   : > { %594 = vpow2.f32 %v520_v20  ;;  %v307_v25 = vmul.f32 %v302_v19, %v289_v23 }
  0xa9   : > { %v800_v26 = vadd.f32 %v318_v24, %v306_v22 }
  0xaa   : > { %v802_v27 = vadd.f32 %v318_v24, %v307_v25 }
  0xab   : > { %v521_v28 = vmul.f32 -1.442695, %v800_v26 }
  0xac   : > { %v522_v29 = vmul.f32 -1.442695, %v802_v27 }
  0xad   : > { %v593_v30 = vpop.eup %592  ;;  %596 = vpow2.f32 %v521_v28 }
  0xae   : > { %v595_v31 = vpop.eup %594  ;;  %v336_v32 = vadd.f32 1.0, %v593_v30  ;;  %598 = vpow2.f32 %v522_v29 }
  0xaf   : > { %v337_v33 = vadd.f32 1.0, %v595_v31 }
  0xb0   : > { %600 = vrcp.f32 %v336_v32  ;;  %v349_v43 = vand.u32 2147483647, %v336_v32  ;;  %v351_v44 = vand.u32 2147483648, %v336_v32  ;;  %vm345_vm3 = vweird.f32 %v336_v32 }
  0xb1   : > { %602 = vrcp.f32 %v337_v33  ;;  %v364_v46 = vand.u32 2147483647, %v337_v33  ;;  %v366_v47 = vand.u32 2147483648, %v337_v33  ;;  %vm360_vm4 = vweird.f32 %v337_v33 }
  0xb2   : > { %vm350_vm6 = vcmp.eq.f32.partialorder %v349_v43, 8.507059e+37  ;;  %v352_v53 = vor.u32 1.1754944e-38, %v351_v44 }
  0xb3   : > { %v597_v34 = vpop.eup %596  ;;  %vm365_vm8 = vcmp.eq.f32.partialorder %v364_v46, 8.507059e+37  ;;  %v367_v56 = vor.u32 1.1754944e-38, %v366_v47 }
  0xb4   : > { %v599_v35 = vpop.eup %598  ;;  %v806_v36 = vadd.f32 1.0, %v597_v34 }
  0xb5   : > { %v808_v37 = vadd.f32 1.0, %v599_v35 }
  0xb6   : > { %v601_v38 = vpop.eup %600  ;;  %604 = vrcp.f32 %v806_v36  ;;  %v379_v60 = vand.u32 2147483647, %v806_v36  ;;  %v381_v61 = vand.u32 2147483648, %v806_v36  ;;  %vm375_vm12 = vweird.f32 %v806_v36 }
  0xb7   : > { %v603_v39 = vpop.eup %602  ;;  %v341_v40 = vmul.f32 %v601_v38, %v336_v32  ;;  %606 = vrcp.f32 %v808_v37  ;;  %vm346_vm2 = vweird.f32 %v601_v38  ;;  %v396_v1 = vand.u32 2147483648, %v808_v37 }
  0xb8   : > { %v356_v41 = vmul.f32 %v603_v39, %v337_v33  ;;  %vm361_vm5 = vweird.f32 %v603_v39  ;;  %vm347_vm7 = vmor %vm345_vm3, %vm346_vm2  ;;  %v394_v7 = vand.u32 2147483647, %v808_v37  ;;  %v382_v9 = vor.u32 1.1754944e-38, %v381_v61 }
  0xb9   : > { %v342_v42 = vsub.f32 1.0, %v341_v40  ;;  %vm362_vm9 = vmor %vm360_vm4, %vm361_vm5  ;;  %vm390_vm14 = vweird.f32 %v808_v37  ;;  %vm380_vm15 = vcmp.eq.f32.partialorder %v379_v60, 8.507059e+37  ;;  %v397_v12 = vor.u32 1.1754944e-38, %v396_v1 }
  0xba   : > { %v357_v45 = vsub.f32 1.0, %v356_v41  ;;  %vm395_vm1 = vcmp.eq.f32.partialorder %v394_v7, 8.507059e+37 }
  0xbb   : > { %v343_v48 = vmul.f32 %v601_v38, %v342_v42 }
  0xbc   : > { %v605_v49 = vpop.eup %604  ;;  %v358_v50 = vmul.f32 %v603_v39, %v357_v45 }
  0xbd   : > { %v607_v51 = vpop.eup %606  ;;  %v344_v52 = vadd.f32 %v601_v38, %v343_v48  ;;  %v371_v54 = vmul.f32 %v605_v49, %v806_v36  ;;  %vm376_vm10 = vweird.f32 %v605_v49 }
  0xbe   : > { %v359_v55 = vadd.f32 %v603_v39, %v358_v50  ;;  %v386_v57 = vmul.f32 %v607_v51, %v808_v37  ;;  %vm391_vm11 = vweird.f32 %v607_v51  ;;  %vm377_vm13 = vmor %vm375_vm12, %vm376_vm10 }
  0xbf   : > { %v348_v58 = vsel %vm347_vm7, %v601_v38, %v344_v52  ;;  %v372_v59 = vsub.f32 1.0, %v371_v54  ;;  %vm392_vm0 = vmor %vm390_vm14, %vm391_vm11 }
  0xc0   : > { %v353_v62 = vsel %vm350_vm6, %v352_v53, %v348_v58  ;;  %v363_v63 = vsel %vm362_vm9, %v603_v39, %v359_v55  ;;  %v387_v0 = vsub.f32 1.0, %v386_v57 }
  0xc1   : > { %v400_v2 = vmul.f32 %v353_v62, %v794_v16  ;;  %v368_v3 = vsel %vm365_vm8, %v367_v56, %v363_v63  ;;  %v373_v4 = vmul.f32 %v605_v49, %v372_v59 }
  0xc2   : > { %v401_v5 = vmul.f32 %v368_v3, %v796_v17  ;;  %v388_v6 = vmul.f32 %v607_v51, %v387_v0 }
  0xc3   : > { %404 = vst [vmem:[%s215_s9] sm:$0xff] %v400_v2  ;;  %v374_v8 = vadd.f32 %v605_v49, %v373_v4 }
  0xc4   : > { %405 = vst [vmem:[%s215_s9 + $0x8] sm:$0xff] %v401_v5  ;;  %v389_v10 = vadd.f32 %v607_v51, %v388_v6 }
  0xc5   : > { %v378_v11 = vsel %vm377_vm13, %v605_v49, %v374_v8 }
  0xc6   : > { %v383_v13 = vsel %vm380_vm15, %v382_v9, %v378_v11  ;;  %v393_v14 = vsel %vm392_vm0, %v607_v51, %v389_v10 }
  0xc7   : > { %v402_v15 = vmul.f32 %v383_v13, %v800_v26  ;;  %v398_v16 = vsel %vm395_vm1, %v397_v12, %v393_v14 }
  0xc8   : > { %v403_v17 = vmul.f32 %v398_v16, %v802_v27 }
  0xc9   : > { %406 = vst [vmem:[%s215_s9 + $0x10] sm:$0xff] %v402_v15 }
  0xca   : > { %407 = vst [vmem:[%s215_s9 + $0x18] sm:$0xff] %v403_v17 }
  0xcb   : > { %635 = shalt.err (!%p632_p5)
}
  0xcc   : > { %s689_s30 = smov 256   ;;  %s690_s5 = smov 16  }
  0xcd   : > { %532 = dma.vmem_to_hbm [thread:$0]  (%p756_p4), %s424_s10, 512, %s426_s11, %s409_s12, %s689_s30, %s689_s30, %s690_s5  }
  0xce PF: > { %p538_p6 = scmp.ge.s32.totalorder %s686_s20, 2  ;;  %s440_s6 = sand.u32 1, %s666_s15  }
  0xcf   : > { %s441_s7 = scalar_lea.sflag [#allocation3], %s440_s6 }
  0xd0   : > { %p535_p7 = pnand %p538_p6, %p763_p8 }
  0xd2   : > { %p536_p9 = pneg %p535_p7 }
  0xd4   : > { %661 = dma.done.wait (%p536_p9), %s441_s7, 512  }
  0xd5   : > { %663 = vsyncadd (%p536_p9), %s441_s7, 4294966784  ;;  %s17_s20 = sadd.s32 1, %s686_s20   ;;  %s876_s15 = smov %s670_s16 }
  0xd6   : > { %p14_p10 = scmp.ge.s32.totalorder %s17_s20, 4   ;;  %s877_s16 = smov %s674_s17 }
  0xd7   : > { %s878_s17 = smov %s769_s28  ;;  %s879_s18 = smov %s682_s19 }
  0xd8   : > { %s880_s19 = smov %s882_s23  ;;  %16 = sbr.rel (!%p14_p10) target bundleno = 4 (0x4), region = 71 }
  0xdd   :  { %447 = vsyncpa [#allocation3], 1 }
  0xde   :  { %449 = vsyncpa [#allocation3 + $0x1], 1 }

</bundles_post_ra>
